<compile_context>
chip_gen: v5e
topology: v5e:2x2
jax: 0.10.0
libtpu: 0.0.40
codegen_flags: <defaults>
</compile_context>

<pallas_src>
import math

import jax
import jax.numpy as jnp
from jax import lax
from jax.experimental import pallas as pl
from jax.experimental.pallas import tpu as pltpu

BN_EPS = 1e-5
LEAKY_SLOPE = 0.1
HIDDEN = 256            # conv1x1 output width, fixed by the module
LANE = 128
SUBLANE = 8


def _round_up(v, m):
    return (v + m - 1) // m * m


def _x_block_bytes(b, tc, hw, itemsize):
    """VMEM-resident bytes of one (b, tc, hw) x block, accounting for the
    (sublane, lane) tile padding of the last two dims and sub-32-bit packing."""
    sub_mult = SUBLANE * max(1, 4 // itemsize)       # 8 f32, 16 bf16, 32 int8
    return b * _round_up(tc, sub_mult) * _round_up(hw, LANE) * itemsize


def _choose_c_tile(b, c, hw, itemsize, budget_bytes):
    """Channel tile TC: full C if its padded block fits the budget; otherwise
    the largest divisor of C (sublane-aligned preferred) whose padded block
    fits.  Falls back to full C if nothing fits (vmem_limit is raised then)."""
    sub_mult = SUBLANE * max(1, 4 // itemsize)
    if _x_block_bytes(b, c, hw, itemsize) <= budget_bytes or c <= sub_mult:
        return c
    divisors = [d for d in range(c - 1, 0, -1) if c % d == 0]
    for d in divisors:                                # layout-friendly first
        if d % sub_mult == 0 and _x_block_bytes(b, d, hw, itemsize) <= budget_bytes:
            return d
    for d in divisors:                                # still block-legal (mult of 8)
        if d % SUBLANE == 0 and _x_block_bytes(b, d, hw, itemsize) <= budget_bytes:
            return d
    return c


def _make_kernel(b, hw, num_c_tiles):
    inv_hw = 1.0 / float(hw)
    inv_b = 1.0 / float(b)

    def kernel(x_ref, wmax_ref, wavg_ref, g1_ref, be1_ref, fc1_ref,
               g2_ref, be2_ref, cls_ref, x2_ref, x1_ref, h_acc):
        k = pl.program_id(0)

        @pl.when(k == 0)
        def _init():
            h_acc[...] = jnp.zeros_like(h_acc)

        # ---- pooling over the spatial (lane) axis for this channel tile ----
        # One upcast per streamed element; max and avg-sum share it.
        # (A packed-bf16 running max is a further v7x-only VPU micro-opt.)
        xf = x_ref[...].astype(jnp.float32)            # (B, TC, HW)
        xmax = jnp.max(xf, axis=-1)                    # (B, TC)
        xavg = jnp.sum(xf, axis=-1) * inv_hw           # (B, TC)

        # ---- partial 1x1-conv (matmul over channels), f32 accumulation ------
        h_acc[...] += (
            jnp.dot(xmax, wmax_ref[...], preferred_element_type=jnp.float32)
            + jnp.dot(xavg, wavg_ref[...], preferred_element_type=jnp.float32)
        )

        # ---- tiny MLP epilogue on the last channel tile ----------------------
        @pl.when(k == num_c_tiles - 1)
        def _finalize():
            h = h_acc[...]                             # (B, 256) f32

            # BatchNorm1d(256): batch stats (biased var), fused scale/shift.
            mu1 = jnp.sum(h, axis=0, keepdims=True) * inv_b
            d1 = h - mu1
            var1 = jnp.sum(d1 * d1, axis=0, keepdims=True) * inv_b
            s1 = lax.rsqrt(var1 + BN_EPS) * g1_ref[...]
            h = h * s1 + (be1_ref[...] - mu1 * s1)

            # LeakyReLU(0.1)
            h = jnp.where(h > 0, h, LEAKY_SLOPE * h)

            # Linear(256 -> NB, bias=False)
            h2 = jnp.dot(h, fc1_ref[...], preferred_element_type=jnp.float32)

            # BatchNorm1d(NB)
            mu2 = jnp.sum(h2, axis=0, keepdims=True) * inv_b
            d2 = h2 - mu2
            var2 = jnp.sum(d2 * d2, axis=0, keepdims=True) * inv_b
            s2 = lax.rsqrt(var2 + BN_EPS) * g2_ref[...]
            x1 = h2 * s2 + (be2_ref[...] - mu2 * s2)

            x1_ref[...] = x1
            # Classifier Linear(NB -> class_num); lane-padded columns keep the
            # store unmasked, padded columns are sliced off by the wrapper.
            x2_ref[...] = jnp.dot(x1, cls_ref[...],
                                  preferred_element_type=jnp.float32)

    return kernel


def class_block_forward(x, params, *, x_block_budget_bytes=None):
    B, C, H, W = x.shape
    HW = H * W

    # Stream x in its native dtype/layout; contiguous reshape is free (no HBM pass).
    x_flat = x.reshape(B, C, HW)
    x_item = jnp.dtype(x_flat.dtype).itemsize

    # ---- generation-dependent VMEM sizing -----------------------------------
    try:
        vmem_cap = int(pltpu.get_tpu_info().vmem_capacity_bytes)
    except Exception:  # pragma: no cover - conservative fallback
        vmem_cap = 64 * 1024 * 1024
    if vmem_cap >= 96 * 1024 * 1024:          # v5e / v6e: 128 MiB physical VMEM
        default_budget = 12 * 1024 * 1024
        vmem_limit = 100 * 1024 * 1024
    else:                                      # v7x: 64 MiB per TensorCore
        default_budget = 8 * 1024 * 1024
        vmem_limit = 52 * 1024 * 1024
    budget = default_budget if x_block_budget_bytes is None else int(x_block_budget_bytes)

    TC = _choose_c_tile(B, C, HW, x_item, budget)
    num_c = C // TC if C % TC == 0 else 1
    if num_c == 1:
        TC = C
    # If the (possibly fallback full-C) block overshoots the budget, raise the
    # scoped limit so the double-buffered pipeline still fits.
    need = 2 * _x_block_bytes(B, TC, HW, x_item) + (16 << 20)
    vmem_limit = min(max(vmem_limit, need), vmem_cap - (8 << 20))

    # ---- weight prep (tiny tensors; negligible vs. streaming x) -------------
    # Conv weight split into max/avg halves -> no concat of pooled features.
    conv_w_t = params["conv_w"].T.astype(jnp.float32)    # (2C, 256)
    wmax = conv_w_t[:C]                                  # (C, 256)
    wavg = conv_w_t[C:]                                  # (C, 256)
    fc1_w_t = params["fc1_w"].T.astype(jnp.float32)      # (256, NB)
    NB = fc1_w_t.shape[1]
    cls_w_t = params["cls_w"].T.astype(jnp.float32)      # (NB, class_num)
    class_num = cls_w_t.shape[1]
    CLS_PAD = _round_up(class_num, LANE)
    if CLS_PAD != class_num:
        cls_w_t = jnp.pad(cls_w_t, ((0, 0), (0, CLS_PAD - class_num)))

    g1 = params["bn1_gamma"].reshape(1, HIDDEN).astype(jnp.float32)
    be1 = params["bn1_beta"].reshape(1, HIDDEN).astype(jnp.float32)
    g2 = params["bn2_gamma"].reshape(1, NB).astype(jnp.float32)
    be2 = params["bn2_beta"].reshape(1, NB).astype(jnp.float32)

    kernel = _make_kernel(B, HW, num_c)

    # NOTE (v7x, very large class_num): the grid-invariant weight specs below
    # could be single-buffered (pipeline_mode=pl.Buffered(1)) to save VMEM;
    # left at the default here since they are tiny relative to the x blocks.
    # NOTE (v7x): a 2-TensorCore channel split (core_map + CMEM combine) is a
    # potential ~2x on the streaming phase — requires profiling first.
    x2_p, x1 = pl.pallas_call(
        kernel,
        grid=(num_c,),
        in_specs=[
            pl.BlockSpec((B, TC, HW), lambda k: (0, k, 0)),   # x channel tile
            pl.BlockSpec((TC, HIDDEN), lambda k: (k, 0)),     # conv W (max half)
            pl.BlockSpec((TC, HIDDEN), lambda k: (k, 0)),     # conv W (avg half)
            pl.BlockSpec((1, HIDDEN), lambda k: (0, 0)),      # bn1 gamma
            pl.BlockSpec((1, HIDDEN), lambda k: (0, 0)),      # bn1 beta
            pl.BlockSpec((HIDDEN, NB), lambda k: (0, 0)),     # fc1 W
            pl.BlockSpec((1, NB), lambda k: (0, 0)),          # bn2 gamma
            pl.BlockSpec((1, NB), lambda k: (0, 0)),          # bn2 beta
            pl.BlockSpec((NB, CLS_PAD), lambda k: (0, 0)),    # classifier W
        ],
        out_specs=(
            pl.BlockSpec((B, CLS_PAD), lambda k: (0, 0)),
            pl.BlockSpec((B, NB), lambda k: (0, 0)),
        ),
        out_shape=(
            jax.ShapeDtypeStruct((B, CLS_PAD), jnp.float32),
            jax.ShapeDtypeStruct((B, NB), jnp.float32),
        ),
        scratch_shapes=[pltpu.VMEM((B, HIDDEN), jnp.float32)],
        compiler_params=pltpu.CompilerParams(
            # Channel axis is a reduction into the conv accumulator.
            dimension_semantics=("arbitrary",),
            vmem_limit_bytes=int(vmem_limit),
        ),
    )(x_flat, wmax, wavg, g1, be1, fc1_w_t, g2, be2, cls_w_t)

    x2 = x2_p[:, :class_num]
    return x2, x1, x1


# -----------------------------------------------------------------------------
# Pure-JAX reference (same dtype policy: native-dtype pooling, f32 everywhere
# else) for a sanity check.
# -----------------------------------------------------------------------------
def _reference_forward(x, params):
    B, C, H, W = x.shape
    HW = H * W
    xf = x.reshape(B, C, HW).astype(jnp.float32)
    xmax = jnp.max(xf, axis=-1)
    xavg = jnp.sum(xf, axis=-1) * (1.0 / HW)
    f = jnp.concatenate([xmax, xavg], axis=1)
    h = jnp.dot(f, params["conv_w"].T.astype(jnp.float32),
                preferred_element_type=jnp.float32)
    mu = jnp.mean(h, axis=0, keepdims=True)
    var = jnp.mean((h - mu) ** 2, axis=0, keepdims=True)
    h = (h - mu) * lax.rsqrt(var + BN_EPS) * params["bn1_gamma"][None] + params["bn1_beta"][None]
    h = jnp.where(h > 0, h, LEAKY_SLOPE * h)
    h2 = jnp.dot(h, params["fc1_w"].T.astype(jnp.float32),
                 preferred_element_type=jnp.float32)
    mu2 = jnp.mean(h2, axis=0, keepdims=True)
    var2 = jnp.mean((h2 - mu2) ** 2, axis=0, keepdims=True)
    x1 = (h2 - mu2) * lax.rsqrt(var2 + BN_EPS) * params["bn2_gamma"][None] + params["bn2_beta"][None]
    x2 = jnp.dot(x1, params["cls_w"].T.astype(jnp.float32),
                 preferred_element_type=jnp.float32)
    return x2, x1


# -----------------------------------------------------------------------------
# Deterministic parameter initialization (matches the torch init distributions)
# -----------------------------------------------------------------------------
def init_params(key, input_dim, class_num, num_bottleneck):
    k_conv, k_bn1, k_fc1, k_bn2, k_cls = jax.random.split(key, 5)

    # Conv2d(2*input_dim, 256, 1, bias=False): kaiming_normal, fan_in mode
    fan_in = 2 * input_dim
    conv_w = jax.random.normal(k_conv, (256, 2 * input_dim), jnp.float32) * math.sqrt(2.0 / fan_in)

    # BatchNorm1d(256): weight ~ N(1, 0.02), bias = 0
    bn1_gamma = 1.0 + 0.02 * jax.random.normal(k_bn1, (256,), jnp.float32)
    bn1_beta = jnp.zeros((256,), jnp.float32)

    # Linear(256, num_bottleneck, bias=False): kaiming_normal, fan_out mode
    fc1_w = jax.random.normal(k_fc1, (num_bottleneck, 256), jnp.float32) * math.sqrt(2.0 / num_bottleneck)

    # BatchNorm1d(num_bottleneck)
    bn2_gamma = 1.0 + 0.02 * jax.random.normal(k_bn2, (num_bottleneck,), jnp.float32)
    bn2_beta = jnp.zeros((num_bottleneck,), jnp.float32)

    # classifier Linear(num_bottleneck, class_num, bias=False): N(0, 0.001)
    cls_w = 0.001 * jax.random.normal(k_cls, (class_num, num_bottleneck), jnp.float32)

    return dict(conv_w=conv_w, bn1_gamma=bn1_gamma, bn1_beta=bn1_beta,
                fc1_w=fc1_w, bn2_gamma=bn2_gamma, bn2_beta=bn2_beta,
                cls_w=cls_w)


# TODO(synk): BatchNorm1d running-mean/var (momentum) buffer updates are a
# training-time side effect of the torch module; the forward outputs here use
# batch statistics exactly as torch does in train(), but no state is updated.

if __name__ == "__main__":
    key = jax.random.PRNGKey(0)

    # (B, C, H, W, class_num, num_bottleneck, x dtype, x-block budget override):
    #   1) tiny demo shape: single channel tile, class_num lane padding, B=2
    #   2) bf16-streamed input, forced multi-tile channel streaming (2 tiles)
    #   3) f32 input, HW < 128 (lane padding in the budget math), 4 tiles
    configs = [
        (2, 4, 16, 16, 10, 32, jnp.float32, None),
        (16, 512, 16, 16, 200, 128, jnp.bfloat16, 2 << 20),
        (4, 64, 8, 8, 100, 64, jnp.float32, 32 << 10),
    ]

    for (B, C, H, W, class_num, nb, xdt, budget) in configs:
        key, k_x, k_p = jax.random.split(key, 3)
        x = jax.random.normal(k_x, (B, C, H, W), jnp.float32).astype(xdt)
        params = init_params(k_p, input_dim=C, class_num=class_num,
                             num_bottleneck=nb)

        x2, x1a, x1b = class_block_forward(x, params, x_block_budget_bytes=budget)
        jax.block_until_ready((x2, x1a, x1b))

        assert x2.shape == (B, class_num)
        assert x1a.shape == (B, nb) and x1b.shape == (B, nb)

        # Sanity check against a pure-JAX reference with the same dtype policy.
        r2, r1 = _reference_forward(x, params)
        mae_x1 = float(jnp.mean(jnp.abs(x1a - r1)))
        err_x2 = float(jnp.max(jnp.abs(x2 - r2)))
        scale_x2 = float(jnp.max(jnp.abs(r2))) + 1e-6
        assert mae_x1 < 5e-3, f"x1 mismatch: mae={mae_x1}"
        assert err_x2 < 0.05 * scale_x2 + 1e-3, f"x2 mismatch: {err_x2}"

    print("KERNEL_OK")
</pallas_src>

<mosaic_0001>
module attributes {stable_mosaic.version = 11 : i64} {
  func.func @kernel(%arg0: i32, %arg1: memref<2x4x256xf32, #tpu.memory_space<vmem>>, %arg2: memref<4x256xf32, #tpu.memory_space<vmem>>, %arg3: memref<4x256xf32, #tpu.memory_space<vmem>>, %arg4: memref<1x256xf32, #tpu.memory_space<vmem>>, %arg5: memref<1x256xf32, #tpu.memory_space<vmem>>, %arg6: memref<256x32xf32, #tpu.memory_space<vmem>>, %arg7: memref<1x32xf32, #tpu.memory_space<vmem>>, %arg8: memref<1x32xf32, #tpu.memory_space<vmem>>, %arg9: memref<32x128xf32, #tpu.memory_space<vmem>>, %arg10: memref<2x128xf32, #tpu.memory_space<vmem>>, %arg11: memref<2x32xf32, #tpu.memory_space<vmem>>, %arg12: memref<2x256xf32, #tpu.memory_space<vmem>>) attributes {dimension_semantics = [#tpu.dimension_semantics<arbitrary>], iteration_bounds = array<i64: 1>, scalar_prefetch = 0 : i64, scratch_operands = 1 : i64, tpu.core_type = #tpu.core_type<tc>, window_params = [{transform_indices = @transform_0, window_bounds = array<i64: 2, 4, 256>}, {transform_indices = @transform_1, window_bounds = array<i64: 4, 256>}, {transform_indices = @transform_2, window_bounds = array<i64: 4, 256>}, {pipeline_mode = #tpu.pipeline_mode<synchronous>, transform_indices = @transform_3, window_bounds = array<i64: 1, 256>}, {pipeline_mode = #tpu.pipeline_mode<synchronous>, transform_indices = @transform_4, window_bounds = array<i64: 1, 256>}, {pipeline_mode = #tpu.pipeline_mode<synchronous>, transform_indices = @transform_5, window_bounds = array<i64: 256, 32>}, {pipeline_mode = #tpu.pipeline_mode<synchronous>, transform_indices = @transform_6, window_bounds = array<i64: 1, 32>}, {pipeline_mode = #tpu.pipeline_mode<synchronous>, transform_indices = @transform_7, window_bounds = array<i64: 1, 32>}, {pipeline_mode = #tpu.pipeline_mode<synchronous>, transform_indices = @transform_8, window_bounds = array<i64: 32, 128>}, {pipeline_mode = #tpu.pipeline_mode<synchronous>, transform_indices = @transform_9, window_bounds = array<i64: 2, 128>}, {pipeline_mode = #tpu.pipeline_mode<synchronous>, transform_indices = @transform_10, window_bounds = array<i64: 2, 32>}]} {
    %c0_i32 = arith.constant 0 : i32
    %0 = arith.cmpi eq, %arg0, %c0_i32 : i32
    %1 = arith.extui %0 : i1 to i32
    %c0_i32_0 = arith.constant 0 : i32
    %2 = arith.cmpi ne, %1, %c0_i32_0 : i32
    scf.if %2 {
      %cst_17 = arith.constant 0.000000e+00 : f32
      %19 = vector.broadcast %cst_17 : f32 to vector<2x256xf32>
      %c0_18 = arith.constant 0 : index
      %c0_19 = arith.constant 0 : index
      %20 = vector.load %arg12[%c0_18, %c0_19] : memref<2x256xf32, #tpu.memory_space<vmem>>, vector<2x256xf32>
      tpu.vector_store %arg12[%c0_18, %c0_19], %19 {strides = array<i32>} : memref<2x256xf32, #tpu.memory_space<vmem>>, vector<2x256xf32>,
    } else {
    }
    %c0 = arith.constant 0 : index
    %c0_1 = arith.constant 0 : index
    %c0_2 = arith.constant 0 : index
    %3 = vector.load %arg1[%c0, %c0_1, %c0_2] : memref<2x4x256xf32, #tpu.memory_space<vmem>>, vector<2x4x256xf32>
    %cst = arith.constant dense<0xFF800000> : vector<2x4xf32>
    %4 = vector.multi_reduction <maximumf>, %3, %cst [2] : vector<2x4x256xf32> to vector<2x4xf32>
    %cst_3 = arith.constant dense<0.000000e+00> : vector<2x4xf32>
    %5 = vector.multi_reduction <add>, %3, %cst_3 [2] : vector<2x4x256xf32> to vector<2x4xf32>
    %cst_4 = arith.constant 3.906250e-03 : f32
    %6 = vector.broadcast %cst_4 : f32 to vector<2x4xf32>
    %7 = arith.mulf %5, %6 : vector<2x4xf32>
    %c0_5 = arith.constant 0 : index
    %c0_6 = arith.constant 0 : index
    %8 = vector.load %arg12[%c0_5, %c0_6] : memref<2x256xf32, #tpu.memory_space<vmem>>, vector<2x256xf32>
    %c0_7 = arith.constant 0 : index
    %c0_8 = arith.constant 0 : index
    %9 = vector.load %arg2[%c0_7, %c0_8] : memref<4x256xf32, #tpu.memory_space<vmem>>, vector<4x256xf32>
    %cst_9 = arith.constant dense<0.000000e+00> : vector<2x256xf32>
    %10 = tpu.matmul %4, %9, %cst_9 {dimension_numbers = #tpu.dot_dimension_numbers<[1], [0], [0], [1], [0, 0, 1, 1], [], []>} : vector<2x4xf32>, vector<4x256xf32>, vector<2x256xf32> -> vector<2x256xf32>
    %c0_10 = arith.constant 0 : index
    %c0_11 = arith.constant 0 : index
    %11 = vector.load %arg3[%c0_10, %c0_11] : memref<4x256xf32, #tpu.memory_space<vmem>>, vector<4x256xf32>
    %cst_12 = arith.constant dense<0.000000e+00> : vector<2x256xf32>
    %12 = tpu.matmul %7, %11, %cst_12 {dimension_numbers = #tpu.dot_dimension_numbers<[1], [0], [0], [1], [0, 0, 1, 1], [], []>} : vector<2x4xf32>, vector<4x256xf32>, vector<2x256xf32> -> vector<2x256xf32>
    %13 = arith.addf %10, %12 : vector<2x256xf32>
    %14 = arith.addf %8, %13 : vector<2x256xf32>
    %c0_13 = arith.constant 0 : index
    %c0_14 = arith.constant 0 : index
    %15 = vector.load %arg12[%c0_13, %c0_14] : memref<2x256xf32, #tpu.memory_space<vmem>>, vector<2x256xf32>
    tpu.vector_store %arg12[%c0_13, %c0_14], %14 {strides = array<i32>} : memref<2x256xf32, #tpu.memory_space<vmem>>, vector<2x256xf32>,
    %c0_i32_15 = arith.constant 0 : i32
    %16 = arith.cmpi eq, %arg0, %c0_i32_15 : i32
    %17 = arith.extui %16 : i1 to i32
    %c0_i32_16 = arith.constant 0 : i32
    %18 = arith.cmpi ne, %17, %c0_i32_16 : i32
    scf.if %18 {
      %c0_17 = arith.constant 0 : index
      %c0_18 = arith.constant 0 : index
      %19 = vector.load %arg12[%c0_17, %c0_18] : memref<2x256xf32, #tpu.memory_space<vmem>>, vector<2x256xf32>
      %cst_19 = arith.constant dense<0.000000e+00> : vector<256xf32>
      %20 = vector.multi_reduction <add>, %19, %cst_19 [0] : vector<2x256xf32> to vector<256xf32>
      %21 = vector.shape_cast %20 : vector<256xf32> to vector<1x256xf32>
      %cst_20 = arith.constant 5.000000e-01 : f32
      %22 = vector.broadcast %cst_20 : f32 to vector<1x256xf32>
      %23 = arith.mulf %21, %22 : vector<1x256xf32>
      %24 = vector.broadcast %23 : vector<1x256xf32> to vector<2x256xf32>
      %25 = arith.subf %19, %24 : vector<2x256xf32>
      %26 = arith.mulf %25, %25 : vector<2x256xf32>
      %cst_21 = arith.constant dense<0.000000e+00> : vector<256xf32>
      %27 = vector.multi_reduction <add>, %26, %cst_21 [0] : vector<2x256xf32> to vector<256xf32>
      %28 = vector.shape_cast %27 : vector<256xf32> to vector<1x256xf32>
      %cst_22 = arith.constant 5.000000e-01 : f32
      %29 = vector.broadcast %cst_22 : f32 to vector<1x256xf32>
      %30 = arith.mulf %28, %29 : vector<1x256xf32>
      %cst_23 = arith.constant 9.99999974E-6 : f32
      %31 = vector.broadcast %cst_23 : f32 to vector<1x256xf32>
      %32 = arith.addf %30, %31 : vector<1x256xf32>
      %33 = math.rsqrt %32 : vector<1x256xf32>
      %c0_24 = arith.constant 0 : index
      %c0_25 = arith.constant 0 : index
      %34 = vector.load %arg4[%c0_24, %c0_25] : memref<1x256xf32, #tpu.memory_space<vmem>>, vector<1x256xf32>
      %35 = arith.mulf %33, %34 : vector<1x256xf32>
      %36 = vector.broadcast %35 : vector<1x256xf32> to vector<2x256xf32>
      %37 = arith.mulf %19, %36 : vector<2x256xf32>
      %c0_26 = arith.constant 0 : index
      %c0_27 = arith.constant 0 : index
      %38 = vector.load %arg5[%c0_26, %c0_27] : memref<1x256xf32, #tpu.memory_space<vmem>>, vector<1x256xf32>
      %39 = arith.mulf %23, %35 : vector<1x256xf32>
      %40 = arith.subf %38, %39 : vector<1x256xf32>
      %41 = vector.broadcast %40 : vector<1x256xf32> to vector<2x256xf32>
      %42 = arith.addf %37, %41 : vector<2x256xf32>
      %cst_28 = arith.constant 0.000000e+00 : f32
      %43 = vector.broadcast %cst_28 : f32 to vector<2x256xf32>
      %44 = arith.cmpf ogt, %42, %43 : vector<2x256xf32>
      %cst_29 = arith.constant 1.000000e-01 : f32
      %45 = vector.broadcast %cst_29 : f32 to vector<2x256xf32>
      %46 = arith.mulf %45, %42 : vector<2x256xf32>
      %47 = arith.select %44, %42, %46 : vector<2x256xi1>, vector<2x256xf32>
      %c0_30 = arith.constant 0 : index
      %c0_31 = arith.constant 0 : index
      %48 = vector.load %arg6[%c0_30, %c0_31] : memref<256x32xf32, #tpu.memory_space<vmem>>, vector<256x32xf32>
      %cst_32 = arith.constant dense<0.000000e+00> : vector<2x32xf32>
      %49 = tpu.matmul %47, %48, %cst_32 {dimension_numbers = #tpu.dot_dimension_numbers<[1], [0], [0], [1], [0, 0, 1, 1], [], []>} : vector<2x256xf32>, vector<256x32xf32>, vector<2x32xf32> -> vector<2x32xf32>
      %cst_33 = arith.constant dense<0.000000e+00> : vector<32xf32>
      %50 = vector.multi_reduction <add>, %49, %cst_33 [0] : vector<2x32xf32> to vector<32xf32>
      %51 = vector.shape_cast %50 : vector<32xf32> to vector<1x32xf32>
      %cst_34 = arith.constant 5.000000e-01 : f32
      %52 = vector.broadcast %cst_34 : f32 to vector<1x32xf32>
      %53 = arith.mulf %51, %52 : vector<1x32xf32>
      %54 = vector.broadcast %53 : vector<1x32xf32> to vector<2x32xf32>
      %55 = arith.subf %49, %54 : vector<2x32xf32>
      %56 = arith.mulf %55, %55 : vector<2x32xf32>
      %cst_35 = arith.constant dense<0.000000e+00> : vector<32xf32>
      %57 = vector.multi_reduction <add>, %56, %cst_35 [0] : vector<2x32xf32> to vector<32xf32>
      %58 = vector.shape_cast %57 : vector<32xf32> to vector<1x32xf32>
      %cst_36 = arith.constant 5.000000e-01 : f32
      %59 = vector.broadcast %cst_36 : f32 to vector<1x32xf32>
      %60 = arith.mulf %58, %59 : vector<1x32xf32>
      %cst_37 = arith.constant 9.99999974E-6 : f32
      %61 = vector.broadcast %cst_37 : f32 to vector<1x32xf32>
      %62 = arith.addf %60, %61 : vector<1x32xf32>
      %63 = math.rsqrt %62 : vector<1x32xf32>
      %c0_38 = arith.constant 0 : index
      %c0_39 = arith.constant 0 : index
      %64 = vector.load %arg7[%c0_38, %c0_39] : memref<1x32xf32, #tpu.memory_space<vmem>>, vector<1x32xf32>
      %65 = arith.mulf %63, %64 : vector<1x32xf32>
      %66 = vector.broadcast %65 : vector<1x32xf32> to vector<2x32xf32>
      %67 = arith.mulf %49, %66 : vector<2x32xf32>
      %c0_40 = arith.constant 0 : index
      %c0_41 = arith.constant 0 : index
      %68 = vector.load %arg8[%c0_40, %c0_41] : memref<1x32xf32, #tpu.memory_space<vmem>>, vector<1x32xf32>
      %69 = arith.mulf %53, %65 : vector<1x32xf32>
      %70 = arith.subf %68, %69 : vector<1x32xf32>
      %71 = vector.broadcast %70 : vector<1x32xf32> to vector<2x32xf32>
      %72 = arith.addf %67, %71 : vector<2x32xf32>
      %c0_42 = arith.constant 0 : index
      %c0_43 = arith.constant 0 : index
      %73 = vector.load %arg11[%c0_42, %c0_43] : memref<2x32xf32, #tpu.memory_space<vmem>>, vector<2x32xf32>
      tpu.vector_store %arg11[%c0_42, %c0_43], %72 {strides = array<i32>} : memref<2x32xf32, #tpu.memory_space<vmem>>, vector<2x32xf32>,
      %c0_44 = arith.constant 0 : index
      %c0_45 = arith.constant 0 : index
      %74 = vector.load %arg9[%c0_44, %c0_45] : memref<32x128xf32, #tpu.memory_space<vmem>>, vector<32x128xf32>
      %cst_46 = arith.constant dense<0.000000e+00> : vector<2x128xf32>
      %75 = tpu.matmul %72, %74, %cst_46 {dimension_numbers = #tpu.dot_dimension_numbers<[1], [0], [0], [1], [0, 0, 1, 1], [], []>} : vector<2x32xf32>, vector<32x128xf32>, vector<2x128xf32> -> vector<2x128xf32>
      %c0_47 = arith.constant 0 : index
      %c0_48 = arith.constant 0 : index
      %76 = vector.load %arg10[%c0_47, %c0_48] : memref<2x128xf32, #tpu.memory_space<vmem>>, vector<2x128xf32>
      tpu.vector_store %arg10[%c0_47, %c0_48], %75 {strides = array<i32>} : memref<2x128xf32, #tpu.memory_space<vmem>>, vector<2x128xf32>,
    } else {
    }
    return
  }
  func.func @transform_0(%arg0: i32) -> (i32, i32, i32) {
    %c0_i32 = arith.constant 0 : i32
    %c0_i32_0 = arith.constant 0 : i32
    %c0_i32_1 = arith.constant 0 : i32
    return %c0_i32, %arg0, %c0_i32_0 : i32, i32, i32
  }
  func.func @transform_1(%arg0: i32) -> (i32, i32) {
    %c0_i32 = arith.constant 0 : i32
    %c0_i32_0 = arith.constant 0 : i32
    return %arg0, %c0_i32 : i32, i32
  }
  func.func @transform_2(%arg0: i32) -> (i32, i32) {
    %c0_i32 = arith.constant 0 : i32
    %c0_i32_0 = arith.constant 0 : i32
    return %arg0, %c0_i32 : i32, i32
  }
  func.func @transform_3(%arg0: i32) -> (i32, i32) {
    %c0_i32 = arith.constant 0 : i32
    %c0_i32_0 = arith.constant 0 : i32
    %c0_i32_1 = arith.constant 0 : i32
    return %c0_i32, %c0_i32_0 : i32, i32
  }
  func.func @transform_4(%arg0: i32) -> (i32, i32) {
    %c0_i32 = arith.constant 0 : i32
    %c0_i32_0 = arith.constant 0 : i32
    %c0_i32_1 = arith.constant 0 : i32
    return %c0_i32, %c0_i32_0 : i32, i32
  }
  func.func @transform_5(%arg0: i32) -> (i32, i32) {
    %c0_i32 = arith.constant 0 : i32
    %c0_i32_0 = arith.constant 0 : i32
    %c0_i32_1 = arith.constant 0 : i32
    return %c0_i32, %c0_i32_0 : i32, i32
  }
  func.func @transform_6(%arg0: i32) -> (i32, i32) {
    %c0_i32 = arith.constant 0 : i32
    %c0_i32_0 = arith.constant 0 : i32
    %c0_i32_1 = arith.constant 0 : i32
    return %c0_i32, %c0_i32_0 : i32, i32
  }
  func.func @transform_7(%arg0: i32) -> (i32, i32) {
    %c0_i32 = arith.constant 0 : i32
    %c0_i32_0 = arith.constant 0 : i32
    %c0_i32_1 = arith.constant 0 : i32
    return %c0_i32, %c0_i32_0 : i32, i32
  }
  func.func @transform_8(%arg0: i32) -> (i32, i32) {
    %c0_i32 = arith.constant 0 : i32
    %c0_i32_0 = arith.constant 0 : i32
    %c0_i32_1 = arith.constant 0 : i32
    return %c0_i32, %c0_i32_0 : i32, i32
  }
  func.func @transform_9(%arg0: i32) -> (i32, i32) {
    %c0_i32 = arith.constant 0 : i32
    %c0_i32_0 = arith.constant 0 : i32
    %c0_i32_1 = arith.constant 0 : i32
    return %c0_i32, %c0_i32_0 : i32, i32
  }
  func.func @transform_10(%arg0: i32) -> (i32, i32) {
    %c0_i32 = arith.constant 0 : i32
    %c0_i32_0 = arith.constant 0 : i32
    %c0_i32_1 = arith.constant 0 : i32
    return %c0_i32, %c0_i32_0 : i32, i32
  }
}

</mosaic_0001>

<bundles_post_ra>
// kernel: tpu_custom_call.1
= control target key start
LH: loop header
LB: loop body
LE: loop exit
PB: predicated region body
PF: predicated region fallthrough
CT: control target
= control target key end

     0   :  { %16 = vsyncpa [#allocation4], 0  ;;  %s811_s0 = inlined_call_operand.vmem [shape: f32[2,4,256], index: 0, kind: input, shape index: {}]   ;;  %s812_s1 = inlined_call_operand.vmem [shape: f32[4,256], index: 1, kind: input, shape index: {}]   ;;  %s813_s2 = inlined_call_operand.vmem [shape: f32[4,256], index: 2, kind: input, shape index: {}]   ;;  %s814_s3 = inlined_call_operand.vmem [shape: f32[1,256], index: 3, kind: input, shape index: {}]   ;;  %s815_s4 = inlined_call_operand.vmem [shape: f32[1,256], index: 4, kind: input, shape index: {}]   ;;  %s816_s5 = inlined_call_operand.vmem [shape: f32[256,32], index: 5, kind: input, shape index: {}]   ;;  %s817_s6 = inlined_call_operand.vmem [shape: f32[1,32], index: 6, kind: input, shape index: {}]   ;;  %s818_s7 = inlined_call_operand.vmem [shape: f32[1,32], index: 7, kind: input, shape index: {}]   ;;  %s819_s8 = inlined_call_operand.vmem [shape: f32[32,128], index: 8, kind: input, shape index: {}]   ;;  %s820_s9 = inlined_call_operand.hbm [shape: f32[2,128], index: 9, kind: output, shape index: {0}]   ;;  %s821_s10 = inlined_call_operand.hbm [shape: f32[2,32], index: 10, kind: output, shape index: {1}]  }
   0x1   :  { %v41_v0 = vld [vmem:[%s811_s0] sm:$0xff]  ;;  %v42_v1 = vld [vmem:[%s811_s0 + $0x8] sm:$0xff] }
   0x2   :  { %45 = vst [vmem:[#allocation1] ss:$2 sm:$0xff] %v41_v0 }
   0x3   :  { %17 = vsyncpa [#allocation6], 0  ;;  %49 = vst [vmem:[#allocation1 + $0x10] ss:$2 sm:$0xff] %v42_v1  ;;  %vm56_vm0 = vcmask 1043456   ;;  %v92_v11 = vld [vmem:[%s813_s2] sm:$0xff]  ;;  %v95_v29 = vlaneseq }
   0x4   :  { %v91_v24 = vld [vmem:[%s812_s1] sm:$0xff]  ;;  %vm99_vm1 = vcmask 1041409   ;;  %vm105_vm2 = vcmask 31744   ;;  %v579_v42 = vmov 0.0   ;;  %vm210_vm3 = vcmask 1041408   ;;  %s580_s25 = smov [#allocation5]  }
   0x5   :  { %v96_v31 = vand.u32 127, %v95_v29  ;;  %40 = vst [vmem:[#allocation2] sm:$0xf] %v579_v42  ;;  %v356_v29 = vld [vmem:[%s816_s5 + $0xe0] sm:$0xff]  ;;  %vm314_vm10 = vcmask 1040384   ;;  %vm406_vm12 = vcmask 254976  }
   0x6   :  { %s493_s26 = sshll.u32 %s580_s25, 4  ;;  %s495_s28 = sshll.u32 %s821_s10, 4  ;;  %s494_s26 = int_to_ptr.vmem [resolvable:$true] %s493_s26  ;;  %s496_s28 = int_to_ptr.hbm [resolvable:$true] %s495_s28 }
   0x7   :  { %s484_s12 = sshll.u32 %s820_s9, 4  ;;  %s485_s12 = int_to_ptr.hbm [resolvable:$true] %s484_s12 }
   0x9   :  { %v46_v2 = vld.sshfl [vmem:[#allocation1] sm:$0xff pattern:$0x75316420]  ;;  %v47_v3 = vld.sshfl [vmem:[#allocation1 + $0x8] sm:$0xff pattern:$0x75316420] }
   0xa   :  { %67 = vst [vmem:[#allocation1] ss:$2 sm:$0xff] %v41_v0  ;;  %v57_v4 = vsel %vm56_vm0, %v46_v2, -inf  ;;  %v58_v5 = vsel %vm56_vm0, %v47_v3, -inf }
   0xb   :  { %v59_v6 = vmax.f32 %v57_v4, %v58_v5  ;;  %v50_v7 = vld.sshfl [vmem:[#allocation1 + $0x10] sm:$0xff pattern:$0x75316420]  ;;  %v51_v8 = vld.sshfl [vmem:[#allocation1 + $0x18] sm:$0xff pattern:$0x75316420] }
   0xc   :  { %71 = vst [vmem:[#allocation1 + $0x10] ss:$2 sm:$0xff] %v42_v1  ;;  %v62_v9 = vsel %vm56_vm0, %v50_v7, -inf  ;;  %v63_v10 = vsel %vm56_vm0, %v51_v8, -inf  ;;  %v90_v49 = vld [vmem:[#allocation2] sm:$0xf] }
   0xd   :  { %60 = vmax.xlane.f32.xlu1 %v59_v6  ;;  %v64_v14 = vmax.f32 %v62_v9, %v63_v10 }
  0x11   :  { %v68_v12 = vld.sshfl [vmem:[#allocation1] sm:$0xff pattern:$0x75316420]  ;;  %v69_v13 = vld.sshfl [vmem:[#allocation1 + $0x8] sm:$0xff pattern:$0x75316420] }
  0x12   :  { %v78_v15 = vsel %vm56_vm0, %v68_v12, 0.0  ;;  %v79_v16 = vsel %vm56_vm0, %v69_v13, 0.0  ;;  %102 = vst [vmem:[#allocation1] ss:$2 sm:$0xff] %v92_v11 }
  0x13   :  { %v80_v17 = vadd.f32 %v79_v16, %v78_v15  ;;  %v72_v18 = vld.sshfl [vmem:[#allocation1 + $0x10] sm:$0xff pattern:$0x75316420]  ;;  %v73_v19 = vld.sshfl [vmem:[#allocation1 + $0x18] sm:$0xff pattern:$0x75316420] }
  0x14   :  { %v83_v20 = vsel %vm56_vm0, %v72_v18, 0.0  ;;  %v84_v21 = vsel %vm56_vm0, %v73_v19, 0.0  ;;  %v343_v16 = vld [vmem:[%s816_s5 + $0x78] sm:$0xff] }
  0x15   :  { %81 = vadd.xlane.f32.xlu0 %v80_v17  ;;  %65 = vmax.xlane.f32.xlu1 %v64_v14  ;;  %v85_v22 = vadd.f32 %v84_v21, %v83_v20  ;;  %v359_v17 = vld [vmem:[%s816_s5 + $0xf8] sm:$0xff]  ;;  %v342_v20 = vld [vmem:[%s816_s5 + $0x70] sm:$0xff] }
  0x16   :  { %366 = vmatpush.msra.mxu0 %v343_v16  ;;  %386 = vmatpush.msra.mxu1 %v359_v17  ;;  %v358_v21 = vld [vmem:[%s816_s5 + $0xf0] sm:$0xff] }
  0x18   :  { %367 = vmatpush.msra.mxu0 %v342_v20  ;;  %387 = vmatpush.msra.mxu1 %v358_v21 }
  0x19   :  { %v103_v23 = vld.sshfl [vmem:[#allocation1] sm:$0xff pattern:$0x75316420]  ;;  %v104_v25 = vld.sshfl [vmem:[#allocation1 + $0x8] sm:$0xff pattern:$0x75316420] }
  0x1a   :  { %509 = vmatpush.msk.msra.mxu3 %vm56_vm0, %v103_v23  ;;  %511 = vmatpush.msk.msra.mxu2 %vm56_vm0, %v104_v25  ;;  %158 = vst [vmem:[#allocation1] ss:$2 sm:$0xff] %v91_v24  ;;  %v341_v24 = vld [vmem:[%s816_s5 + $0x68] sm:$0xff] }
  0x1b   :  { %v357_v25 = vld [vmem:[%s816_s5 + $0xe8] sm:$0xff]  ;;  %368 = vmatpush.msra.mxu0 %v341_v24  ;;  %v308_v24 = vld [vmem:[%s815_s4] sm:$0x3] }
  0x1c   :  { %388 = vmatpush.msra.mxu1 %v357_v25 }
  0x1d   :  { %86 = vadd.xlane.f32.xlu0 %v85_v22 }
  0x1e   :  { %389 = vmatpush.msra.mxu1 %v356_v29 }
  0x21   :  { %v160_v26 = vld.sshfl [vmem:[#allocation1 + $0x8] sm:$0xff pattern:$0x75316420]  ;;  %v159_v27 = vld.sshfl [vmem:[#allocation1] sm:$0xff pattern:$0x75316420] }
  0x22   :  { %515 = vmatpush.msk.msrb.mxu3 %vm56_vm0, %v160_v26  ;;  %513 = vmatpush.msk.msrb.mxu2 %vm56_vm0, %v159_v27  ;;  %vm452_vm0 = vcmask 261120  }
  0x80   :  { %v61_v30 = vpop.xlane.xlu1 %60 }
  0x81   :  { %v154_v39 = vperm.slane %v61_v30, %v96_v31 }
  0x88   :  { %v82_v28 = vpop.xlane.xlu0 %81  ;;  %v66_v38 = vpop.xlane.xlu1 %65 }
  0x89   :  { %v88_v32 = vmul.f32 0.00390625, %v82_v28  ;;  %v155_v40 = vperm.slane %v66_v38, %v96_v31  ;;  %v340_v28 = vld [vmem:[%s816_s5 + $0x60] sm:$0xff] }
  0x8a   :  { %369 = vmatpush.msra.mxu0 %v340_v28 }
  0x8b   :  { %v97_v35 = vperm.slane %v88_v32, %v96_v31  ;;  %v156_v41 = vsel %vm99_vm1, %v155_v40, %v154_v39  ;;  %v339_v32 = vld [vmem:[%s816_s5 + $0x58] sm:$0xff]  ;;  %v337_v40 = vld [vmem:[%s816_s5 + $0x48] sm:$0xff] }
  0x8c   :  { %370 = vmatpush.msra.mxu0 %v339_v32 }
  0x90   :  { %v87_v33 = vpop.xlane.xlu0 %86 }
  0x91   :  { %v89_v34 = vmul.f32 0.00390625, %v87_v33  ;;  %v355_v33 = vld [vmem:[%s816_s5 + $0xd8] sm:$0xff] }
  0x92   :  { %390 = vmatpush.msra.mxu1 %v355_v33 }
  0x93   :  { %v98_v36 = vperm.slane %v89_v34, %v96_v31 }
  0x95   :  { %v100_v37 = vsel %vm99_vm1, %v98_v36, %v97_v35  ;;  %v338_v36 = vld [vmem:[%s816_s5 + $0x50] sm:$0xff] }
  0x96   :  { %510 = vmatmul.msk.f32.vlgmr.msra.gmra.mxu3 %vm105_vm2, %v100_v37  ;;  %512 = vmatmul.msk.f32.vlgmr.msra.gmra.mxu2 %vm105_vm2, %v100_v37  ;;  %v354_v37 = vld [vmem:[%s816_s5 + $0xd0] sm:$0xff] }
  0x97   :  { %371 = vmatpush.msra.mxu0 %v338_v36  ;;  %391 = vmatpush.msra.mxu1 %v354_v37 }
  0x99   :  { %372 = vmatpush.msra.mxu0 %v337_v40 }
  0x9e   :  { %514 = vmatmul.msk.f32.vlgmr.msrb.gmra.mxu2 %vm105_vm2, %v156_v41  ;;  %516 = vmatmul.msk.f32.vlgmr.msrb.gmra.mxu3 %vm105_vm2, %v156_v41  ;;  %v353_v41 = vld [vmem:[%s816_s5 + $0xc8] sm:$0xff] }
  0x9f   :  { %392 = vmatpush.msra.mxu1 %v353_v41 }
 0x119   :  { %v129_v43 = vpop.f32.mrf.mxu3  ;;  %v149_v44 = vpop.f32.mrf.mxu2 }
 0x121   :  { %v184_v45 = vpop.f32.mrf.mxu2  ;;  %v204_v46 = vpop.f32.mrf.mxu3 }
 0x122   :  { %v205_v47 = vadd.f32 %v204_v46, %v149_v44  ;;  %v185_v48 = vadd.f32 %v184_v45, %v129_v43  ;;  %v336_v44 = vld [vmem:[%s816_s5 + $0x40] sm:$0xff] }
 0x123   :  { %v352_v45 = vld [vmem:[%s816_s5 + $0xc0] sm:$0xff]  ;;  %373 = vmatpush.msra.mxu0 %v336_v44 }
 0x124   :  { %v209_v50 = vrot.slane %v205_v47, 6  ;;  %393 = vmatpush.msra.mxu1 %v352_v45 }
 0x126   :  { %v211_v51 = vsel %vm210_vm3, %v185_v48, %v209_v50  ;;  %v335_v48 = vld [vmem:[%s816_s5 + $0x38] sm:$0xff]  ;;  %v334_v50 = vld [vmem:[%s816_s5 + $0x30] sm:$0xff] }
 0x127   :  { %v213_v52 = vadd.f32 %v211_v51, %v90_v49  ;;  %v351_v49 = vld [vmem:[%s816_s5 + $0xb8] sm:$0xff]  ;;  %374 = vmatpush.msra.mxu0 %v335_v48  ;;  %v350_v51 = vld [vmem:[%s816_s5 + $0xb0] sm:$0xff] }
 0x128   :  { %394 = vmatpush.msra.mxu1 %v351_v49 }
 0x129   :  { %214 = vst [vmem:[#allocation2] sm:$0xf] %v213_v52  ;;  %375 = vmatpush.msra.mxu0 %v334_v50  ;;  %v333_v52 = vld [vmem:[%s816_s5 + $0x28] sm:$0xff] }
 0x12a   :  { %395 = vmatpush.msra.mxu1 %v350_v51 }
 0x12b   :  { %376 = vmatpush.msra.mxu0 %v333_v52 }
 0x130   :  { %v662_v53 = vld [vmem:[#allocation2] sm:$0xf] }
 0x131   :  { %220 = vst [vmem:[#allocation1] ss:$4 sm:$0xff] %v662_v53 }
 0x138   :  { %v221_v54 = vld.sshfl [vmem:[#allocation1] sm:$0xff pattern:$0x73625140]  ;;  %v222_v55 = vld.sshfl [vmem:[#allocation1 + $0x8] sm:$0xff pattern:$0x73625140] }
 0x139   :  { %v225_v56 = vsel %vm210_vm3, %v221_v54, 0.0  ;;  %v232_v57 = vsel %vm210_vm3, %v222_v55, 0.0  ;;  %v349_v54 = vld [vmem:[%s816_s5 + $0xa8] sm:$0xff]  ;;  %v332_v55 = vld [vmem:[%s816_s5 + $0x20] sm:$0xff] }
 0x13a   :  { %v226_v58 = vrot.slane %v225_v56, 4  ;;  %v233_v59 = vrot.slane %v232_v57, 4  ;;  %396 = vmatpush.msra.mxu1 %v349_v54  ;;  %377 = vmatpush.msra.mxu0 %v332_v55 }
 0x13c   :  { %v227_v60 = vadd.f32 %v226_v58, %v225_v56  ;;  %v234_v61 = vadd.f32 %v233_v59, %v232_v57  ;;  %v348_v56 = vld [vmem:[%s816_s5 + $0xa0] sm:$0xff]  ;;  %v331_v58 = vld [vmem:[%s816_s5 + $0x18] sm:$0xff] }
 0x13d   :  { %397 = vmatpush.msra.mxu1 %v348_v56  ;;  %v347_v59 = vld [vmem:[%s816_s5 + $0x98] sm:$0xff]  ;;  %378 = vmatpush.msra.mxu0 %v331_v58 }
 0x13e   :  { %v228_v62 = vrot.slane %v227_v60, 2  ;;  %v235_v63 = vrot.slane %v234_v61, 2 }
 0x13f   :  { %398 = vmatpush.msra.mxu1 %v347_v59  ;;  %v450_v59 = vld [vmem:[%s819_s8 + $0x10] sm:$0xff] }
 0x140   :  { %v229_v0 = vadd.f32 %v228_v62, %v227_v60  ;;  %v236_v1 = vadd.f32 %v235_v63, %v234_v61  ;;  %v330_v62 = vld [vmem:[%s816_s5 + $0x10] sm:$0xff] }
 0x141   :  { %v346_v63 = vld [vmem:[%s816_s5 + $0x90] sm:$0xff]  ;;  %379 = vmatpush.msra.mxu0 %v330_v62 }
 0x142   :  { %v230_v2 = vrot.slane %v229_v0, 1  ;;  %v237_v3 = vrot.slane %v236_v1, 1  ;;  %399 = vmatpush.msra.mxu1 %v346_v63  ;;  %v448_v63 = vld [vmem:[%s819_s8] sm:$0xff] }
 0x144   :  { %v231_v4 = vadd.f32 %v230_v2, %v229_v0  ;;  %v238_v5 = vadd.f32 %v237_v3, %v236_v1  ;;  %v329_v2 = vld [vmem:[%s816_s5 + $0x8] sm:$0xff] }
 0x145   :  { %v345_v3 = vld [vmem:[%s816_s5 + $0x88] sm:$0xff]  ;;  %380 = vmatpush.msra.mxu0 %v329_v2 }
 0x146   :  { %v667_v6 = vmul.f32 0.5, %v238_v5  ;;  %v669_v7 = vmul.f32 0.5, %v231_v4  ;;  %400 = vmatpush.msra.mxu1 %v345_v3 }
 0x148   :  { %v243_v8 = vrot.slane %v667_v6, 6 }
 0x14a   :  { %v244_v9 = vsel %vm210_vm3, %v669_v7, %v243_v8  ;;  %v328_v8 = vld [vmem:[%s816_s5] sm:$0xff] }
 0x14b   :  { %v246_v10 = vsub.f32 %v662_v53, %v244_v9  ;;  %v344_v9 = vld [vmem:[%s816_s5 + $0x80] sm:$0xff]  ;;  %381 = vmatpush.msra.mxu0 %v328_v8 }
 0x14c   :  { %401 = vmatpush.msra.mxu1 %v344_v9 }
 0x14d   :  { %v247_v11 = vmul.f32 %v246_v10, %v246_v10 }
 0x14f   :  { %249 = vst [vmem:[#allocation1] ss:$4 sm:$0xff] %v247_v11  ;;  %v292_v11 = vld [vmem:[%s814_s3] sm:$0x3] }
 0x150   :  { %v295_v16 = vperm.slane %v292_v11, 1 }
 0x156   :  { %v250_v12 = vld.sshfl [vmem:[#allocation1] sm:$0xff pattern:$0x73625140]  ;;  %v251_v13 = vld.sshfl [vmem:[#allocation1 + $0x8] sm:$0xff pattern:$0x73625140] }
 0x157   :  { %v254_v14 = vsel %vm210_vm3, %v250_v12, 0.0  ;;  %v261_v15 = vsel %vm210_vm3, %v251_v13, 0.0 }
 0x158   :  { %v255_v18 = vrot.slane %v254_v14, 4  ;;  %v262_v19 = vrot.slane %v261_v15, 4 }
 0x15a   :  { %v256_v22 = vadd.f32 %v255_v18, %v254_v14  ;;  %v263_v23 = vadd.f32 %v262_v19, %v261_v15  ;;  %v294_v15 = vperm.slane %v292_v11, 0 }
 0x15c   :  { %v257_v26 = vrot.slane %v256_v22, 2  ;;  %v264_v27 = vrot.slane %v263_v23, 2 }
 0x15e   :  { %v258_v30 = vadd.f32 %v257_v26, %v256_v22  ;;  %v265_v31 = vadd.f32 %v264_v27, %v263_v23 }
 0x160   :  { %v259_v34 = vrot.slane %v258_v30, 1  ;;  %v266_v35 = vrot.slane %v265_v31, 1 }
 0x162   :  { %v260_v38 = vadd.f32 %v259_v34, %v258_v30  ;;  %v267_v39 = vadd.f32 %v266_v35, %v265_v31 }
 0x164   :  { %v268_v42 = vmul.f32 0.5, %v260_v38  ;;  %v269_v43 = vmul.f32 0.5, %v267_v39 }
 0x166   :  { %v270_v46 = vadd.f32 1e-05, %v268_v42  ;;  %v271_v47 = vadd.f32 1e-05, %v269_v43 }
 0x168   :  { %521 = vrsqrt.f32 %v270_v46  ;;  %vm278_vm6 = vweird.f32 %v270_v46  ;;  %vm288_vm8 = vweird.f32 %v271_v47 }
 0x169   :  { %523 = vrsqrt.f32 %v271_v47 }
 0x16e   :  { %v522_v57 = vpop.eup %521 }
 0x16f   :  { %v524_v60 = vpop.eup %523  ;;  %v273_v61 = vmul.f32 %v522_v57, %v270_v46  ;;  %vm279_vm4 = vweird.f32 %v522_v57 }
 0x170   :  { %v283_v0 = vmul.f32 %v524_v60, %v271_v47  ;;  %vm289_vm5 = vweird.f32 %v524_v60  ;;  %vm280_vm7 = vmor %vm278_vm6, %vm279_vm4 }
 0x171   :  { %v274_v1 = vmul.f32 %v522_v57, %v273_v61  ;;  %vm290_vm9 = vmor %vm288_vm8, %vm289_vm5  ;;  %v449_v61 = vld [vmem:[%s819_s8 + $0x8] sm:$0xff] }
 0x172   :  { %v284_v4 = vmul.f32 %v524_v60, %v283_v0 }
 0x173   :  { %v275_v5 = vmul.f32 0.5, %v274_v1 }
 0x174   :  { %v285_v10 = vmul.f32 0.5, %v284_v4 }
 0x175   :  { %v276_v12 = vsub.f32 1.5, %v275_v5 }
 0x176   :  { %v286_v13 = vsub.f32 1.5, %v285_v10  ;;  %v436_v10 = vld [vmem:[%s817_s6] sm:$0x1] }
 0x177   :  { %v277_v14 = vmul.f32 %v522_v57, %v276_v12 }
 0x178   :  { %v287_v17 = vmul.f32 %v524_v60, %v286_v13  ;;  %v440_v13 = vld [vmem:[%s818_s7] sm:$0x1]  ;;  %s581_s7 = smov [#allocation3]  }
 0x179   :  { %v281_v18 = vsel %vm280_vm7, %v522_v57, %v277_v14  ;;  %v451_v57 = vld [vmem:[%s819_s8 + $0x18] sm:$0xff]  ;;  %s482_s29 = sshll.u32 %s581_s7, 4  ;;  %s483_s29 = int_to_ptr.vmem [resolvable:$true] %s482_s29 }
 0x17a   :  { %v291_v19 = vsel %vm290_vm9, %v524_v60, %v287_v17  ;;  %v298_v20 = vmul.f32 %v294_v15, %v281_v18  ;;  %468 = vmatpush.msra.mxu2 %v451_v57 }
 0x17b   :  { %v299_v21 = vmul.f32 %v295_v16, %v291_v19 }
 0x17c   :  { %v309_v25 = vmul.f32 %v298_v20, %v669_v7  ;;  %v300_v29 = vperm.slane %v298_v20, 0  ;;  %469 = vmatpush.msra.mxu2 %v450_v59 }
 0x17d   :  { %v301_v22 = vperm.slane %v299_v21, 0  ;;  %v310_v23 = vmul.f32 %v299_v21, %v667_v6 }
 0x17e   :  { %470 = vmatpush.msra.mxu2 %v449_v61 }
 0x17f   :  { %v313_v26 = vrot.slane %v310_v23, 7  ;;  %v304_v27 = vrot.slane %v301_v22, 6 }
 0x180   :  { %471 = vmatpush.msra.mxu2 %v448_v63 }
 0x181   :  { %v315_v28 = vsel %vm314_vm10, %v309_v25, %v313_v26  ;;  %v305_v31 = vsel %vm210_vm3, %v300_v29, %v304_v27 }
 0x182   :  { %v317_v30 = vsub.f32 %v308_v24, %v315_v28  ;;  %v307_v35 = vmul.f32 %v305_v31, %v662_v53 }
 0x184   :  { %v320_v32 = vperm.slane %v317_v30, 1  ;;  %v319_v33 = vperm.slane %v317_v30, 0 }
 0x186   :  { %v321_v34 = vrot.slane %v320_v32, 6 }
 0x188   :  { %v322_v6 = vsel %vm210_vm3, %v319_v33, %v321_v34 }
 0x189   :  { %v324_v36 = vadd.f32 %v322_v6, %v307_v35 }
 0x18b   :  { %vm325_vm11 = vcmp.gt.f32.partialorder %v324_v36, 0.0  ;;  %v326_v37 = vmul.f32 0.1, %v324_v36 }
 0x18d   :  { %v327_v38 = vsel %vm325_vm11, %v324_v36, %v326_v37 }
 0x18e   :  { %361 = vst [vmem:[#allocation1] ss:$4 sm:$0xff] %v327_v38 }
 0x195   :  { %v362_v7 = vld.sshfl [vmem:[#allocation1] sm:$0xff pattern:$0x73625140]  ;;  %v363_v39 = vld.sshfl [vmem:[#allocation1 + $0x8] sm:$0xff pattern:$0x73625140] }
 0x196   :  { %382 = vmatmul.f32.vlgmr.msra.gmra.mxu0 %v362_v7  ;;  %402 = vmatmul.f32.vlgmr.msra.gmra.mxu1 %v363_v39 }
 0x213   :  { %v383_v40 = vpop.f32.mrf.mxu0  ;;  %v403_v41 = vpop.f32.mrf.mxu1 }
 0x214   :  { %v404_v42 = vadd.f32 %v403_v41, %v383_v40 }
 0x216   :  { %v407_v43 = vsel %vm406_vm12, %v404_v42, 0.0 }
 0x217   :  { %v408_v44 = vrot.slane %v407_v43, 4 }
 0x219   :  { %v409_v45 = vadd.f32 %v408_v44, %v407_v43 }
 0x21b   :  { %v410_v53 = vrot.slane %v409_v45, 2 }
 0x21d   :  { %v411_v46 = vadd.f32 %v410_v53, %v409_v45 }
 0x21f   :  { %v412_v47 = vrot.slane %v411_v46, 1 }
 0x221   :  { %v413_v48 = vadd.f32 %v412_v47, %v411_v46 }
 0x223   :  { %v414_v49 = vmul.f32 0.5, %v413_v48 }
 0x225   :  { %v415_v50 = vsub.f32 %v404_v42, %v414_v49 }
 0x227   :  { %v416_v51 = vmul.f32 %v415_v50, %v415_v50 }
 0x229   :  { %v417_v52 = vsel %vm406_vm12, %v416_v51, 0.0 }
 0x22a   :  { %v418_v54 = vrot.slane %v417_v52, 4 }
 0x22c   :  { %v419_v55 = vadd.f32 %v418_v54, %v417_v52 }
 0x22e   :  { %v420_v56 = vrot.slane %v419_v55, 2 }
 0x230   :  { %v421_v58 = vadd.f32 %v420_v56, %v419_v55 }
 0x232   :  { %v422_v60 = vrot.slane %v421_v58, 1 }
 0x234   :  { %v423_v62 = vadd.f32 %v422_v60, %v421_v58 }
 0x236   :  { %v424_v0 = vmul.f32 0.5, %v423_v62 }
 0x238   :  { %v425_v1 = vadd.f32 1e-05, %v424_v0 }
 0x23a   :  { %525 = vrsqrt.f32 %v425_v1  ;;  %vm432_vm14 = vweird.f32 %v425_v1 }
 0x240   :  { %v526_v2 = vpop.eup %525 }
 0x241   :  { %v427_v3 = vmul.f32 %v526_v2, %v425_v1  ;;  %vm433_vm13 = vweird.f32 %v526_v2 }
 0x242   :  { %vm434_vm15 = vmor %vm432_vm14, %vm433_vm13 }
 0x243   :  { %v428_v4 = vmul.f32 %v526_v2, %v427_v3 }
 0x245   :  { %v429_v5 = vmul.f32 0.5, %v428_v4 }
 0x247   :  { %v430_v8 = vsub.f32 1.5, %v429_v5 }
 0x249   :  { %v431_v9 = vmul.f32 %v526_v2, %v430_v8 }
 0x24b   :  { %v435_v11 = vsel %vm434_vm15, %v526_v2, %v431_v9 }
 0x24c   :  { %v437_v12 = vmul.f32 %v436_v10, %v435_v11 }
 0x24e   :  { %v438_v14 = vperm.slane %v437_v12, 0  ;;  %v441_v15 = vmul.f32 %v437_v12, %v414_v49 }
 0x250   :  { %v442_v16 = vsub.f32 %v440_v13, %v441_v15  ;;  %v439_v17 = vmul.f32 %v438_v14, %v404_v42 }
 0x252   :  { %v444_v18 = vperm.slane %v442_v16, 0 }
 0x254   :  { %v446_v19 = vadd.f32 %v444_v18, %v439_v17 }
 0x256   :  { %447 = vst.msk [vmem:[#allocation5] sm:$0x3] %vm406_vm12, %v446_v19  ;;  %517 = vmatmul.msk.f32.vlgmr.msra.gmra.mxu2 %vm452_vm0, %v446_v19 }
 0x257   :  { %498 = dma.vmem_to_hbm [thread:$0]  %s494_s26, 32, %s496_s28, [#allocation6]  }
 0x2d9   :  { %v473_v20 = vpop.f32.mrf.mxu2 }
 0x2da   :  { %476 = vst [vmem:[#allocation3] sm:$0x3] %v473_v20 }
 0x2db   :  { %487 = dma.vmem_to_hbm [thread:$0]  %s483_s29, 32, %s485_s12, [#allocation4]  }
 0x2dc   :  { %575 = dma.done.wait [#allocation4], 32  }
 0x2dd   :  { %576 = vsyncadd [#allocation4], 4294967264 }
 0x2de   :  { %577 = dma.done.wait [#allocation6], 32  }
 0x2df   :  { %578 = vsyncadd [#allocation6], 4294967264 }
 0x2e0   :  { %507 = vsyncpa [#allocation4], 1 }
 0x2e1   :  { %508 = vsyncpa [#allocation6], 1 }

</bundles_post_ra>
